<compile_context>
chip_gen: v6e
topology: v6e:2x2x1
jax: 0.10.0
libtpu: 0.0.40
codegen_flags: <defaults>
</compile_context>

<pallas_src>
import functools

import jax
import jax.numpy as jnp
from jax.experimental import pallas as pl
from jax.experimental.pallas import tpu as pltpu


def _round_up(a, b):
    return ((a + b - 1) // b) * b


def _cdiv(a, b):
    return -(-a // b)


def _default_num_cores():
    """2-way outer split only on chips with 2 TensorCores per chip (v7x);
    on v5e/v6e the grid is a serial loop, so an outer split is pure overhead."""
    try:
        kind = jax.devices()[0].device_kind.lower()
        if "v7" in kind:
            return 2
    except Exception:
        pass
    return 1


# ----------------------------------------------------------------------------
# Kernel
# ----------------------------------------------------------------------------
def _vae_kernel(valid_rows, needs_mask,
                x_ref, noise_ref,
                w1_ref, b1_ref, w2_ref, b2_ref,
                wml_ref, bml_ref,
                wd0_ref, bd0_ref, wd1_ref, bd1_ref, wd2_ref, bd2_ref,
                z_ref, sse_ref, kl_ref):
    c = pl.program_id(0)          # core / outer split (size 1 on v5e/v6e)
    i = pl.program_id(1)          # row-tile index within this core's slice
    n_inner = pl.num_programs(1)

    tile = x_ref.shape[0]
    L = noise_ref.shape[1]

    x = x_ref[...]                                  # (tile, D) float32
    xb = x.astype(jnp.bfloat16)

    # ---- encoder: Linear -> ReLU (x2) ----
    h = jnp.dot(xb, w1_ref[...], preferred_element_type=jnp.float32) + b1_ref[...]
    h = jnp.maximum(h, 0.0)
    h = jnp.dot(h.astype(jnp.bfloat16), w2_ref[...],
                preferred_element_type=jnp.float32) + b2_ref[...]
    h = jnp.maximum(h, 0.0)
    hb = h.astype(jnp.bfloat16)

    # ---- fused latent heads: one (H, 2L) matmul, lane-slice mu | logvar ----
    ml = jnp.dot(hb, wml_ref[...], preferred_element_type=jnp.float32) + bml_ref[...]
    mu = ml[:, :L]
    lv = ml[:, L:]

    # ---- reparameterization: z = noise * exp(0.5*logvar) + mu ----
    std = jnp.exp(0.5 * lv)
    z = noise_ref[...] * std + mu
    z_ref[...] = z.astype(z_ref.dtype)

    # ---- decoder: Linear->ReLU, Linear->ReLU, Linear->sigmoid ----
    d = jnp.dot(z.astype(jnp.bfloat16), wd0_ref[...],
                preferred_element_type=jnp.float32) + bd0_ref[...]
    d = jnp.maximum(d, 0.0)
    d = jnp.dot(d.astype(jnp.bfloat16), wd1_ref[...],
                preferred_element_type=jnp.float32) + bd1_ref[...]
    d = jnp.maximum(d, 0.0)
    d = jnp.dot(d.astype(jnp.bfloat16), wd2_ref[...],
                preferred_element_type=jnp.float32) + bd2_ref[...]
    x_hat = jax.nn.sigmoid(d)

    # ---- per-step loss terms (masked only when padding exists) ----
    diff = x_hat - x
    se = diff * diff                                # (tile, D)
    kt = 1.0 + lv - mu * mu - jnp.exp(lv)           # (tile, L)

    if needs_mask:
        row0 = (c * n_inner + i) * tile
        rows = row0 + jax.lax.broadcasted_iota(jnp.int32, (tile, 1), 0)
        maskf = (rows < valid_rows).astype(jnp.float32)
        se = se * maskf
        kt = kt * maskf

    # ---- accumulate scalar partials directly into resident output blocks ----
    @pl.when(i == 0)
    def _():
        sse_ref[...] = jnp.zeros_like(sse_ref)
        kl_ref[...] = jnp.zeros_like(kl_ref)

    sse_ref[...] += jnp.sum(se).reshape(1, 1, 1)
    kl_ref[...] += jnp.sum(kt).reshape(1, 1, 1)


# ----------------------------------------------------------------------------
# Parameter packing (done once, outside the forward pass)
# ----------------------------------------------------------------------------
def prepare_params(raw):
    """Cast matmul weights to bf16 and fuse the mu/logvar heads into one weight."""
    bf16, f32 = jnp.bfloat16, jnp.float32
    return {
        "w1": raw["w1"].astype(bf16), "b1": raw["b1"].astype(f32),
        "w2": raw["w2"].astype(bf16), "b2": raw["b2"].astype(f32),
        "w_ml": jnp.concatenate([raw["w_mu"], raw["w_lv"]], axis=1).astype(bf16),
        "b_ml": jnp.concatenate([raw["b_mu"], raw["b_lv"]], axis=1).astype(f32),
        "wd0": raw["wd0"].astype(bf16), "bd0": raw["bd0"].astype(f32),
        "wd1": raw["wd1"].astype(bf16), "bd1": raw["bd1"].astype(f32),
        "wd2": raw["wd2"].astype(bf16), "bd2": raw["bd2"].astype(f32),
    }


# ----------------------------------------------------------------------------
# Wrapper
# ----------------------------------------------------------------------------
def simple_vae_bottom_forward(x, noise, params, *, tile_rows=512, num_cores=None):
    """x: (B, T, D) float32; noise: (B, T, latent) float32 (torch.randn equivalent).
    params: output of prepare_params()."""
    B, T, D = x.shape
    L = noise.shape[-1]
    M = B * T
    H = params["w1"].shape[1]
    L2 = 2 * L

    if num_cores is None:
        num_cores = _default_num_cores()

    # Tile selection: single grid step for small M; big tiles otherwise
    # (this kernel is per-grid-step-overhead bound, not compute bound).
    tile = min(tile_rows, _round_up(M, 16))
    n_blocks = _cdiv(M, tile)
    num_cores = max(1, min(num_cores, n_blocks))
    inner = _cdiv(n_blocks, num_cores)
    Mp = num_cores * inner * tile
    needs_mask = (Mp != M)
    # NOTE: Mp (and hence the compiled kernel) depends on M; distinct B*T values
    # recompile. Unavoidable since input shapes change with M.

    x2 = x.reshape(M, D).astype(jnp.float32)
    n2 = noise.reshape(M, L).astype(jnp.float32)
    if needs_mask:
        x2 = jnp.pad(x2, ((0, Mp - M), (0, 0)))
        n2 = jnp.pad(n2, ((0, Mp - M), (0, 0)))

    row_map = lambda c, i: (c * inner + i, 0)
    wmap = lambda c, i: (0, 0)
    core_map = lambda c, i: (c, 0, 0)
    full = lambda shape: pl.BlockSpec(shape, wmap)

    in_specs = [
        pl.BlockSpec((tile, D), row_map),   # x tile
        pl.BlockSpec((tile, L), row_map),   # noise tile
        full((D, H)), full((1, H)),         # w1, b1
        full((H, H)), full((1, H)),         # w2, b2
        full((H, L2)), full((1, L2)),       # fused [w_mu | w_lv], [b_mu | b_lv]
        full((L, H)), full((1, H)),         # wd0, bd0
        full((H, H)), full((1, H)),         # wd1, bd1
        full((H, D)), full((1, D)),         # wd2, bd2
    ]
    out_specs = [
        pl.BlockSpec((tile, L), row_map),   # z (y_hat); padded rows dropped later
        pl.BlockSpec((1, 1, 1), core_map),  # per-core sum of squared errors
        pl.BlockSpec((1, 1, 1), core_map),  # per-core sum of (1+lv-mu^2-exp(lv))
    ]
    out_shape = (
        jax.ShapeDtypeStruct((Mp, L), jnp.float32),
        jax.ShapeDtypeStruct((num_cores, 1, 1), jnp.float32),
        jax.ShapeDtypeStruct((num_cores, 1, 1), jnp.float32),
    )

    # Explicit VMEM budget (weights are double-buffered by the pipeline even
    # though their block never changes) -> cap at 64 MiB so this stays safe on v7x.
    weight_bytes = 2 * (D * H + H * H + H * L2 + L * H + H * H + H * D) \
        + 4 * (3 * H + L2 + D)
    io_tile_bytes = 4 * tile * (D + 2 * L)
    act_bytes = 8 * tile * (2 * H + L2 + D)          # rough live-temporary bound
    vmem_est = 2 * (weight_bytes + io_tile_bytes) + act_bytes
    vmem_limit = int(min(max(2 * vmem_est, 32 * 1024 * 1024), 64 * 1024 * 1024))

    matmul_flops = 2 * Mp * (D * H + H * H + H * L2 + L * H + H * H + H * D)
    cost = pl.CostEstimate(
        flops=int(matmul_flops),
        transcendentals=int(Mp * (2 * L + D)),
        bytes_accessed=int(4 * Mp * (D + 2 * L) + weight_bytes + 8 * num_cores),
    )

    kernel = functools.partial(_vae_kernel, M, needs_mask)

    z2, sse_part, kl_part = pl.pallas_call(
        kernel,
        out_shape=out_shape,
        grid_spec=pltpu.PrefetchScalarGridSpec(
            num_scalar_prefetch=0,
            grid=(num_cores, inner),
            in_specs=in_specs,
            out_specs=out_specs,
            scratch_shapes=[],
        ),
        compiler_params=pltpu.CompilerParams(
            dimension_semantics=("parallel", "arbitrary"),
            vmem_limit_bytes=vmem_limit,
        ),
        cost_estimate=cost,
    )(x2, n2,
      params["w1"], params["b1"], params["w2"], params["b2"],
      params["w_ml"], params["b_ml"],
      params["wd0"], params["bd0"], params["wd1"], params["bd1"],
      params["wd2"], params["bd2"])

    y_hat = z2[:M].reshape(B, T, L)
    # F.mse_loss (reduction='mean' over all M*D elements); KL is a plain sum * -0.5.
    recon_loss = jnp.sum(sse_part) / float(M * D)
    kl_loss = -0.5 * jnp.sum(kl_part)
    return y_hat, (recon_loss, kl_loss)


# ----------------------------------------------------------------------------
# Deterministic parameter init (xavier_uniform weights, bias = 0.01)
# ----------------------------------------------------------------------------
def _xavier_uniform(key, fan_in, fan_out):
    bound = (6.0 / (fan_in + fan_out)) ** 0.5
    return jax.random.uniform(key, (fan_in, fan_out), jnp.float32, -bound, bound)


def init_params(key, input_dim, hidden_dim, latent_dim):
    keys = jax.random.split(key, 7)
    bias = lambda n: jnp.full((1, n), 0.01, jnp.float32)
    return {
        "w1": _xavier_uniform(keys[0], input_dim, hidden_dim), "b1": bias(hidden_dim),
        "w2": _xavier_uniform(keys[1], hidden_dim, hidden_dim), "b2": bias(hidden_dim),
        "w_mu": _xavier_uniform(keys[2], hidden_dim, latent_dim), "b_mu": bias(latent_dim),
        "w_lv": _xavier_uniform(keys[3], hidden_dim, latent_dim), "b_lv": bias(latent_dim),
        "wd0": _xavier_uniform(keys[4], latent_dim, hidden_dim), "bd0": bias(hidden_dim),
        "wd1": _xavier_uniform(keys[5], hidden_dim, hidden_dim), "bd1": bias(hidden_dim),
        "wd2": _xavier_uniform(keys[6], hidden_dim, input_dim), "bd2": bias(input_dim),
    }


def _reference_forward(x, noise, p):
    """Pure-JAX fp32 reference mirroring SimpleVAEBottom.forward."""
    relu = lambda v: jnp.maximum(v, 0.0)
    h = relu(x @ p["w1"] + p["b1"])
    h = relu(h @ p["w2"] + p["b2"])
    mu = h @ p["w_mu"] + p["b_mu"]
    lv = h @ p["w_lv"] + p["b_lv"]
    z = noise * jnp.exp(0.5 * lv) + mu
    d = relu(z @ p["wd0"] + p["bd0"])
    d = relu(d @ p["wd1"] + p["bd1"])
    x_hat = jax.nn.sigmoid(d @ p["wd2"] + p["bd2"])
    recon = jnp.mean((x_hat - x) ** 2)
    kl = -0.5 * jnp.sum(1.0 + lv - mu ** 2 - jnp.exp(lv))
    return z, (recon, kl)


# ----------------------------------------------------------------------------
if __name__ == "__main__":
    # Small shapes consistent with a 3D (time-dependent) input; module defaults
    # hidden_dim=128, latent_dim=32, num_layers=2.
    B, T = 2, 8
    input_dim, hidden_dim, latent_dim = 16, 128, 32

    root = jax.random.PRNGKey(0)
    k_x, k_noise, k_params = jax.random.split(root, 3)

    x = jax.random.uniform(k_x, (B, T, input_dim), jnp.float32)
    # TODO(synk): torch.randn is drawn inside forward(); here the reparameterization
    # noise is an explicit input (could alternatively use pltpu.prng_* in-kernel).
    noise = jax.random.normal(k_noise, (B, T, latent_dim), jnp.float32)

    raw = init_params(k_params, input_dim, hidden_dim, latent_dim)
    params = prepare_params(raw)

    y_hat, (recon_loss, kl_loss) = simple_vae_bottom_forward(x, noise, params)
    jax.block_until_ready((y_hat, recon_loss, kl_loss))

    # Parity vs fp32 reference (loose tolerance: kernel matmuls run in bf16).
    y_ref, (rl_ref, kl_ref) = _reference_forward(x, noise, raw)

    assert y_hat.shape == (B, T, latent_dim)
    assert bool(jnp.all(jnp.isfinite(y_hat)))
    assert bool(jnp.isfinite(recon_loss)) and bool(jnp.isfinite(kl_loss))
    assert bool(jnp.allclose(y_hat, y_ref, rtol=5e-2, atol=5e-2))
    assert bool(jnp.allclose(recon_loss, rl_ref, rtol=5e-2, atol=5e-2))
    assert bool(jnp.allclose(kl_loss, kl_ref, rtol=5e-2, atol=5e-1))
    print("KERNEL_OK")
</pallas_src>

<mosaic_0001>
module attributes {stable_mosaic.version = 11 : i64} {
  func.func @_vae_kernel(%arg0: i32, %arg1: i32, %arg2: memref<16x16xf32, #tpu.memory_space<vmem>>, %arg3: memref<16x32xf32, #tpu.memory_space<vmem>>, %arg4: memref<16x128xbf16, #tpu.memory_space<vmem>>, %arg5: memref<1x128xf32, #tpu.memory_space<vmem>>, %arg6: memref<128x128xbf16, #tpu.memory_space<vmem>>, %arg7: memref<1x128xf32, #tpu.memory_space<vmem>>, %arg8: memref<128x64xbf16, #tpu.memory_space<vmem>>, %arg9: memref<1x64xf32, #tpu.memory_space<vmem>>, %arg10: memref<32x128xbf16, #tpu.memory_space<vmem>>, %arg11: memref<1x128xf32, #tpu.memory_space<vmem>>, %arg12: memref<128x128xbf16, #tpu.memory_space<vmem>>, %arg13: memref<1x128xf32, #tpu.memory_space<vmem>>, %arg14: memref<128x16xbf16, #tpu.memory_space<vmem>>, %arg15: memref<1x16xf32, #tpu.memory_space<vmem>>, %arg16: memref<16x32xf32, #tpu.memory_space<vmem>>, %arg17: memref<1x1x1xf32, #tpu.memory_space<vmem>>, %arg18: memref<1x1x1xf32, #tpu.memory_space<vmem>>) attributes {dimension_semantics = [#tpu.dimension_semantics<parallel>, #tpu.dimension_semantics<arbitrary>], iteration_bounds = array<i64: 1, 1>, scalar_prefetch = 0 : i64, scratch_operands = 0 : i64, tpu.core_type = #tpu.core_type<tc>, window_params = [{transform_indices = @transform_0, window_bounds = array<i64: 16, 16>}, {transform_indices = @transform_1, window_bounds = array<i64: 16, 32>}, {pipeline_mode = #tpu.pipeline_mode<synchronous>, transform_indices = @transform_2, window_bounds = array<i64: 16, 128>}, {pipeline_mode = #tpu.pipeline_mode<synchronous>, transform_indices = @transform_3, window_bounds = array<i64: 1, 128>}, {pipeline_mode = #tpu.pipeline_mode<synchronous>, transform_indices = @transform_4, window_bounds = array<i64: 128, 128>}, {pipeline_mode = #tpu.pipeline_mode<synchronous>, transform_indices = @transform_5, window_bounds = array<i64: 1, 128>}, {pipeline_mode = #tpu.pipeline_mode<synchronous>, transform_indices = @transform_6, window_bounds = array<i64: 128, 64>}, {pipeline_mode = #tpu.pipeline_mode<synchronous>, transform_indices = @transform_7, window_bounds = array<i64: 1, 64>}, {pipeline_mode = #tpu.pipeline_mode<synchronous>, transform_indices = @transform_8, window_bounds = array<i64: 32, 128>}, {pipeline_mode = #tpu.pipeline_mode<synchronous>, transform_indices = @transform_9, window_bounds = array<i64: 1, 128>}, {pipeline_mode = #tpu.pipeline_mode<synchronous>, transform_indices = @transform_10, window_bounds = array<i64: 128, 128>}, {pipeline_mode = #tpu.pipeline_mode<synchronous>, transform_indices = @transform_11, window_bounds = array<i64: 1, 128>}, {pipeline_mode = #tpu.pipeline_mode<synchronous>, transform_indices = @transform_12, window_bounds = array<i64: 128, 16>}, {pipeline_mode = #tpu.pipeline_mode<synchronous>, transform_indices = @transform_13, window_bounds = array<i64: 1, 16>}, {transform_indices = @transform_14, window_bounds = array<i64: 16, 32>}, {transform_indices = @transform_15, window_bounds = array<i64: 1, 1, 1>}, {transform_indices = @transform_16, window_bounds = array<i64: 1, 1, 1>}]} {
    %c0 = arith.constant 0 : index
    %c0_0 = arith.constant 0 : index
    %0 = vector.load %arg2[%c0, %c0_0] : memref<16x16xf32, #tpu.memory_space<vmem>>, vector<16x16xf32>
    %1 = arith.truncf %0 : vector<16x16xf32> to vector<16x16xbf16>
    %c0_1 = arith.constant 0 : index
    %c0_2 = arith.constant 0 : index
    %2 = vector.load %arg4[%c0_1, %c0_2] : memref<16x128xbf16, #tpu.memory_space<vmem>>, vector<16x128xbf16>
    %cst = arith.constant dense<0.000000e+00> : vector<16x128xf32>
    %3 = tpu.matmul %1, %2, %cst {dimension_numbers = #tpu.dot_dimension_numbers<[1], [0], [0], [1], [0, 0, 1, 1], [], []>} : vector<16x16xbf16>, vector<16x128xbf16>, vector<16x128xf32> -> vector<16x128xf32>
    %c0_3 = arith.constant 0 : index
    %c0_4 = arith.constant 0 : index
    %4 = vector.load %arg5[%c0_3, %c0_4] : memref<1x128xf32, #tpu.memory_space<vmem>>, vector<1x128xf32>
    %5 = vector.broadcast %4 : vector<1x128xf32> to vector<16x128xf32>
    %6 = arith.addf %3, %5 : vector<16x128xf32>
    %cst_5 = arith.constant 0.000000e+00 : f32
    %7 = vector.broadcast %cst_5 : f32 to vector<16x128xf32>
    %8 = arith.maximumf %6, %7 : vector<16x128xf32>
    %9 = arith.truncf %8 : vector<16x128xf32> to vector<16x128xbf16>
    %c0_6 = arith.constant 0 : index
    %c0_7 = arith.constant 0 : index
    %10 = vector.load %arg6[%c0_6, %c0_7] : memref<128x128xbf16, #tpu.memory_space<vmem>>, vector<128x128xbf16>
    %cst_8 = arith.constant dense<0.000000e+00> : vector<16x128xf32>
    %11 = tpu.matmul %9, %10, %cst_8 {dimension_numbers = #tpu.dot_dimension_numbers<[1], [0], [0], [1], [0, 0, 1, 1], [], []>} : vector<16x128xbf16>, vector<128x128xbf16>, vector<16x128xf32> -> vector<16x128xf32>
    %c0_9 = arith.constant 0 : index
    %c0_10 = arith.constant 0 : index
    %12 = vector.load %arg7[%c0_9, %c0_10] : memref<1x128xf32, #tpu.memory_space<vmem>>, vector<1x128xf32>
    %13 = vector.broadcast %12 : vector<1x128xf32> to vector<16x128xf32>
    %14 = arith.addf %11, %13 : vector<16x128xf32>
    %cst_11 = arith.constant 0.000000e+00 : f32
    %15 = vector.broadcast %cst_11 : f32 to vector<16x128xf32>
    %16 = arith.maximumf %14, %15 : vector<16x128xf32>
    %17 = arith.truncf %16 : vector<16x128xf32> to vector<16x128xbf16>
    %c0_12 = arith.constant 0 : index
    %c0_13 = arith.constant 0 : index
    %18 = vector.load %arg8[%c0_12, %c0_13] : memref<128x64xbf16, #tpu.memory_space<vmem>>, vector<128x64xbf16>
    %cst_14 = arith.constant dense<0.000000e+00> : vector<16x64xf32>
    %19 = tpu.matmul %17, %18, %cst_14 {dimension_numbers = #tpu.dot_dimension_numbers<[1], [0], [0], [1], [0, 0, 1, 1], [], []>} : vector<16x128xbf16>, vector<128x64xbf16>, vector<16x64xf32> -> vector<16x64xf32>
    %c0_15 = arith.constant 0 : index
    %c0_16 = arith.constant 0 : index
    %20 = vector.load %arg9[%c0_15, %c0_16] : memref<1x64xf32, #tpu.memory_space<vmem>>, vector<1x64xf32>
    %21 = vector.broadcast %20 : vector<1x64xf32> to vector<16x64xf32>
    %22 = arith.addf %19, %21 : vector<16x64xf32>
    %23 = vector.extract_strided_slice %22 {offsets = [0, 0], sizes = [16, 32], strides = [1, 1]} : vector<16x64xf32> to vector<16x32xf32>
    %24 = vector.extract_strided_slice %22 {offsets = [0, 32], sizes = [16, 32], strides = [1, 1]} : vector<16x64xf32> to vector<16x32xf32>
    %cst_17 = arith.constant 5.000000e-01 : f32
    %25 = vector.broadcast %cst_17 : f32 to vector<16x32xf32>
    %26 = arith.mulf %25, %24 : vector<16x32xf32>
    %27 = math.exp %26 : vector<16x32xf32>
    %c0_18 = arith.constant 0 : index
    %c0_19 = arith.constant 0 : index
    %28 = vector.load %arg3[%c0_18, %c0_19] : memref<16x32xf32, #tpu.memory_space<vmem>>, vector<16x32xf32>
    %29 = arith.mulf %28, %27 : vector<16x32xf32>
    %30 = arith.addf %29, %23 : vector<16x32xf32>
    %c0_20 = arith.constant 0 : index
    %c0_21 = arith.constant 0 : index
    %31 = vector.load %arg16[%c0_20, %c0_21] : memref<16x32xf32, #tpu.memory_space<vmem>>, vector<16x32xf32>
    tpu.vector_store %arg16[%c0_20, %c0_21], %30 {strides = array<i32>} : memref<16x32xf32, #tpu.memory_space<vmem>>, vector<16x32xf32>,
    %32 = arith.truncf %30 : vector<16x32xf32> to vector<16x32xbf16>
    %c0_22 = arith.constant 0 : index
    %c0_23 = arith.constant 0 : index
    %33 = vector.load %arg10[%c0_22, %c0_23] : memref<32x128xbf16, #tpu.memory_space<vmem>>, vector<32x128xbf16>
    %cst_24 = arith.constant dense<0.000000e+00> : vector<16x128xf32>
    %34 = tpu.matmul %32, %33, %cst_24 {dimension_numbers = #tpu.dot_dimension_numbers<[1], [0], [0], [1], [0, 0, 1, 1], [], []>} : vector<16x32xbf16>, vector<32x128xbf16>, vector<16x128xf32> -> vector<16x128xf32>
    %c0_25 = arith.constant 0 : index
    %c0_26 = arith.constant 0 : index
    %35 = vector.load %arg11[%c0_25, %c0_26] : memref<1x128xf32, #tpu.memory_space<vmem>>, vector<1x128xf32>
    %36 = vector.broadcast %35 : vector<1x128xf32> to vector<16x128xf32>
    %37 = arith.addf %34, %36 : vector<16x128xf32>
    %cst_27 = arith.constant 0.000000e+00 : f32
    %38 = vector.broadcast %cst_27 : f32 to vector<16x128xf32>
    %39 = arith.maximumf %37, %38 : vector<16x128xf32>
    %40 = arith.truncf %39 : vector<16x128xf32> to vector<16x128xbf16>
    %c0_28 = arith.constant 0 : index
    %c0_29 = arith.constant 0 : index
    %41 = vector.load %arg12[%c0_28, %c0_29] : memref<128x128xbf16, #tpu.memory_space<vmem>>, vector<128x128xbf16>
    %cst_30 = arith.constant dense<0.000000e+00> : vector<16x128xf32>
    %42 = tpu.matmul %40, %41, %cst_30 {dimension_numbers = #tpu.dot_dimension_numbers<[1], [0], [0], [1], [0, 0, 1, 1], [], []>} : vector<16x128xbf16>, vector<128x128xbf16>, vector<16x128xf32> -> vector<16x128xf32>
    %c0_31 = arith.constant 0 : index
    %c0_32 = arith.constant 0 : index
    %43 = vector.load %arg13[%c0_31, %c0_32] : memref<1x128xf32, #tpu.memory_space<vmem>>, vector<1x128xf32>
    %44 = vector.broadcast %43 : vector<1x128xf32> to vector<16x128xf32>
    %45 = arith.addf %42, %44 : vector<16x128xf32>
    %cst_33 = arith.constant 0.000000e+00 : f32
    %46 = vector.broadcast %cst_33 : f32 to vector<16x128xf32>
    %47 = arith.maximumf %45, %46 : vector<16x128xf32>
    %48 = arith.truncf %47 : vector<16x128xf32> to vector<16x128xbf16>
    %c0_34 = arith.constant 0 : index
    %c0_35 = arith.constant 0 : index
    %49 = vector.load %arg14[%c0_34, %c0_35] : memref<128x16xbf16, #tpu.memory_space<vmem>>, vector<128x16xbf16>
    %cst_36 = arith.constant dense<0.000000e+00> : vector<16x16xf32>
    %50 = tpu.matmul %48, %49, %cst_36 {dimension_numbers = #tpu.dot_dimension_numbers<[1], [0], [0], [1], [0, 0, 1, 1], [], []>} : vector<16x128xbf16>, vector<128x16xbf16>, vector<16x16xf32> -> vector<16x16xf32>
    %c0_37 = arith.constant 0 : index
    %c0_38 = arith.constant 0 : index
    %51 = vector.load %arg15[%c0_37, %c0_38] : memref<1x16xf32, #tpu.memory_space<vmem>>, vector<1x16xf32>
    %52 = vector.broadcast %51 : vector<1x16xf32> to vector<16x16xf32>
    %53 = arith.addf %50, %52 : vector<16x16xf32>
    %54 = arith.negf %53 : vector<16x16xf32>
    %55 = math.exp %54 : vector<16x16xf32>
    %cst_39 = arith.constant 1.000000e+00 : f32
    %56 = vector.broadcast %cst_39 : f32 to vector<16x16xf32>
    %57 = arith.addf %56, %55 : vector<16x16xf32>
    %58 = arith.divf %56, %57 : vector<16x16xf32>
    %59 = arith.subf %58, %0 : vector<16x16xf32>
    %60 = arith.mulf %59, %59 : vector<16x16xf32>
    %cst_40 = arith.constant 1.000000e+00 : f32
    %61 = vector.broadcast %cst_40 : f32 to vector<16x32xf32>
    %62 = arith.addf %61, %24 : vector<16x32xf32>
    %63 = arith.mulf %23, %23 : vector<16x32xf32>
    %64 = arith.subf %62, %63 : vector<16x32xf32>
    %65 = math.exp %24 : vector<16x32xf32>
    %66 = arith.subf %64, %65 : vector<16x32xf32>
    %c0_i32 = arith.constant 0 : i32
    %67 = arith.cmpi eq, %arg1, %c0_i32 : i32
    %68 = arith.extui %67 : i1 to i32
    %c0_i32_41 = arith.constant 0 : i32
    %69 = arith.cmpi ne, %68, %c0_i32_41 : i32
    scf.if %69 {
      %cst_56 = arith.constant 0.000000e+00 : f32
      %86 = vector.broadcast %cst_56 : f32 to vector<1x1x1xf32>
      %c0_57 = arith.constant 0 : index
      %c0_58 = arith.constant 0 : index
      %c0_59 = arith.constant 0 : index
      %87 = vector.load %arg17[%c0_57, %c0_58, %c0_59] : memref<1x1x1xf32, #tpu.memory_space<vmem>>, vector<1x1x1xf32>
      tpu.vector_store %arg17[%c0_57, %c0_58, %c0_59], %86 {strides = array<i32>} : memref<1x1x1xf32, #tpu.memory_space<vmem>>, vector<1x1x1xf32>,
      %cst_60 = arith.constant 0.000000e+00 : f32
      %88 = vector.broadcast %cst_60 : f32 to vector<1x1x1xf32>
      %c0_61 = arith.constant 0 : index
      %c0_62 = arith.constant 0 : index
      %c0_63 = arith.constant 0 : index
      %89 = vector.load %arg18[%c0_61, %c0_62, %c0_63] : memref<1x1x1xf32, #tpu.memory_space<vmem>>, vector<1x1x1xf32>
      tpu.vector_store %arg18[%c0_61, %c0_62, %c0_63], %88 {strides = array<i32>} : memref<1x1x1xf32, #tpu.memory_space<vmem>>, vector<1x1x1xf32>,
    } else {
    }
    %c0_42 = arith.constant 0 : index
    %c0_43 = arith.constant 0 : index
    %c0_44 = arith.constant 0 : index
    %70 = vector.load %arg17[%c0_42, %c0_43, %c0_44] : memref<1x1x1xf32, #tpu.memory_space<vmem>>, vector<1x1x1xf32>
    %71 = vector.shape_cast %60 : vector<16x16xf32> to vector<1x16x16xf32>
    %cst_45 = arith.constant dense<0.000000e+00> : vector<1xf32>
    %72 = vector.multi_reduction <add>, %71, %cst_45 [1, 2] : vector<1x16x16xf32> to vector<1xf32>
    %73 = vector.shape_cast %72 : vector<1xf32> to vector<1x1x1xf32>
    %74 = vector.extract %73[0, 0, 0] : f32 from vector<1x1x1xf32>
    %75 = vector.broadcast %74 : f32 to vector<1x1x1xf32>
    %76 = arith.addf %70, %75 : vector<1x1x1xf32>
    %c0_46 = arith.constant 0 : index
    %c0_47 = arith.constant 0 : index
    %c0_48 = arith.constant 0 : index
    %77 = vector.load %arg17[%c0_46, %c0_47, %c0_48] : memref<1x1x1xf32, #tpu.memory_space<vmem>>, vector<1x1x1xf32>
    tpu.vector_store %arg17[%c0_46, %c0_47, %c0_48], %76 {strides = array<i32>} : memref<1x1x1xf32, #tpu.memory_space<vmem>>, vector<1x1x1xf32>,
    %c0_49 = arith.constant 0 : index
    %c0_50 = arith.constant 0 : index
    %c0_51 = arith.constant 0 : index
    %78 = vector.load %arg18[%c0_49, %c0_50, %c0_51] : memref<1x1x1xf32, #tpu.memory_space<vmem>>, vector<1x1x1xf32>
    %79 = vector.shape_cast %66 : vector<16x32xf32> to vector<1x16x32xf32>
    %cst_52 = arith.constant dense<0.000000e+00> : vector<1xf32>
    %80 = vector.multi_reduction <add>, %79, %cst_52 [1, 2] : vector<1x16x32xf32> to vector<1xf32>
    %81 = vector.shape_cast %80 : vector<1xf32> to vector<1x1x1xf32>
    %82 = vector.extract %81[0, 0, 0] : f32 from vector<1x1x1xf32>
    %83 = vector.broadcast %82 : f32 to vector<1x1x1xf32>
    %84 = arith.addf %78, %83 : vector<1x1x1xf32>
    %c0_53 = arith.constant 0 : index
    %c0_54 = arith.constant 0 : index
    %c0_55 = arith.constant 0 : index
    %85 = vector.load %arg18[%c0_53, %c0_54, %c0_55] : memref<1x1x1xf32, #tpu.memory_space<vmem>>, vector<1x1x1xf32>
    tpu.vector_store %arg18[%c0_53, %c0_54, %c0_55], %84 {strides = array<i32>} : memref<1x1x1xf32, #tpu.memory_space<vmem>>, vector<1x1x1xf32>,
    return
  }
  func.func @transform_0(%arg0: i32, %arg1: i32) -> (i32, i32) {
    %c1_i32 = arith.constant 1 : i32
    %0 = arith.muli %arg0, %c1_i32 : i32
    %1 = arith.addi %0, %arg1 : i32
    %c0_i32 = arith.constant 0 : i32
    %c0_i32_0 = arith.constant 0 : i32
    return %1, %c0_i32 : i32, i32
  }
  func.func @transform_1(%arg0: i32, %arg1: i32) -> (i32, i32) {
    %c1_i32 = arith.constant 1 : i32
    %0 = arith.muli %arg0, %c1_i32 : i32
    %1 = arith.addi %0, %arg1 : i32
    %c0_i32 = arith.constant 0 : i32
    %c0_i32_0 = arith.constant 0 : i32
    return %1, %c0_i32 : i32, i32
  }
  func.func @transform_2(%arg0: i32, %arg1: i32) -> (i32, i32) {
    %c0_i32 = arith.constant 0 : i32
    %c0_i32_0 = arith.constant 0 : i32
    %c0_i32_1 = arith.constant 0 : i32
    return %c0_i32, %c0_i32_0 : i32, i32
  }
  func.func @transform_3(%arg0: i32, %arg1: i32) -> (i32, i32) {
    %c0_i32 = arith.constant 0 : i32
    %c0_i32_0 = arith.constant 0 : i32
    %c0_i32_1 = arith.constant 0 : i32
    return %c0_i32, %c0_i32_0 : i32, i32
  }
  func.func @transform_4(%arg0: i32, %arg1: i32) -> (i32, i32) {
    %c0_i32 = arith.constant 0 : i32
    %c0_i32_0 = arith.constant 0 : i32
    %c0_i32_1 = arith.constant 0 : i32
    return %c0_i32, %c0_i32_0 : i32, i32
  }
  func.func @transform_5(%arg0: i32, %arg1: i32) -> (i32, i32) {
    %c0_i32 = arith.constant 0 : i32
    %c0_i32_0 = arith.constant 0 : i32
    %c0_i32_1 = arith.constant 0 : i32
    return %c0_i32, %c0_i32_0 : i32, i32
  }
  func.func @transform_6(%arg0: i32, %arg1: i32) -> (i32, i32) {
    %c0_i32 = arith.constant 0 : i32
    %c0_i32_0 = arith.constant 0 : i32
    %c0_i32_1 = arith.constant 0 : i32
    return %c0_i32, %c0_i32_0 : i32, i32
  }
  func.func @transform_7(%arg0: i32, %arg1: i32) -> (i32, i32) {
    %c0_i32 = arith.constant 0 : i32
    %c0_i32_0 = arith.constant 0 : i32
    %c0_i32_1 = arith.constant 0 : i32
    return %c0_i32, %c0_i32_0 : i32, i32
  }
  func.func @transform_8(%arg0: i32, %arg1: i32) -> (i32, i32) {
    %c0_i32 = arith.constant 0 : i32
    %c0_i32_0 = arith.constant 0 : i32
    %c0_i32_1 = arith.constant 0 : i32
    return %c0_i32, %c0_i32_0 : i32, i32
  }
  func.func @transform_9(%arg0: i32, %arg1: i32) -> (i32, i32) {
    %c0_i32 = arith.constant 0 : i32
    %c0_i32_0 = arith.constant 0 : i32
    %c0_i32_1 = arith.constant 0 : i32
    return %c0_i32, %c0_i32_0 : i32, i32
  }
  func.func @transform_10(%arg0: i32, %arg1: i32) -> (i32, i32) {
    %c0_i32 = arith.constant 0 : i32
    %c0_i32_0 = arith.constant 0 : i32
    %c0_i32_1 = arith.constant 0 : i32
    return %c0_i32, %c0_i32_0 : i32, i32
  }
  func.func @transform_11(%arg0: i32, %arg1: i32) -> (i32, i32) {
    %c0_i32 = arith.constant 0 : i32
    %c0_i32_0 = arith.constant 0 : i32
    %c0_i32_1 = arith.constant 0 : i32
    return %c0_i32, %c0_i32_0 : i32, i32
  }
  func.func @transform_12(%arg0: i32, %arg1: i32) -> (i32, i32) {
    %c0_i32 = arith.constant 0 : i32
    %c0_i32_0 = arith.constant 0 : i32
    %c0_i32_1 = arith.constant 0 : i32
    return %c0_i32, %c0_i32_0 : i32, i32
  }
  func.func @transform_13(%arg0: i32, %arg1: i32) -> (i32, i32) {
    %c0_i32 = arith.constant 0 : i32
    %c0_i32_0 = arith.constant 0 : i32
    %c0_i32_1 = arith.constant 0 : i32
    return %c0_i32, %c0_i32_0 : i32, i32
  }
  func.func @transform_14(%arg0: i32, %arg1: i32) -> (i32, i32) {
    %c1_i32 = arith.constant 1 : i32
    %0 = arith.muli %arg0, %c1_i32 : i32
    %1 = arith.addi %0, %arg1 : i32
    %c0_i32 = arith.constant 0 : i32
    %c0_i32_0 = arith.constant 0 : i32
    return %1, %c0_i32 : i32, i32
  }
  func.func @transform_15(%arg0: i32, %arg1: i32) -> (i32, i32, i32) {
    %c0_i32 = arith.constant 0 : i32
    %c0_i32_0 = arith.constant 0 : i32
    %c0_i32_1 = arith.constant 0 : i32
    return %arg0, %c0_i32, %c0_i32_0 : i32, i32, i32
  }
  func.func @transform_16(%arg0: i32, %arg1: i32) -> (i32, i32, i32) {
    %c0_i32 = arith.constant 0 : i32
    %c0_i32_0 = arith.constant 0 : i32
    %c0_i32_1 = arith.constant 0 : i32
    return %arg0, %c0_i32, %c0_i32_0 : i32, i32, i32
  }
}

</mosaic_0001>

<bundles_post_ra>
// kernel: tpu_custom_call.1
= control target key start
LH: loop header
LB: loop body
LE: loop exit
PB: predicated region body
PF: predicated region fallthrough
CT: control target
= control target key end

     0   :  { %s1662_s0 = inlined_call_operand.vmem [shape: f32[16,16], index: 0, kind: input, shape index: {}]   ;;  %s1663_s1 = inlined_call_operand.vmem [shape: f32[16,32], index: 1, kind: input, shape index: {}]   ;;  %s1664_s2 = inlined_call_operand.hbm [shape: bf16[16,128], index: 2, kind: input, shape index: {}]   ;;  %s1665_s3 = inlined_call_operand.hbm [shape: f32[1,128], index: 3, kind: input, shape index: {}]   ;;  %s1666_s4 = inlined_call_operand.vmem [shape: bf16[128,128], index: 4, kind: input, shape index: {}]   ;;  %s1667_s5 = inlined_call_operand.hbm [shape: f32[1,128], index: 5, kind: input, shape index: {}]   ;;  %s1668_s6 = inlined_call_operand.vmem [shape: bf16[128,64], index: 6, kind: input, shape index: {}]   ;;  %s1669_s7 = inlined_call_operand.hbm [shape: f32[1,64], index: 7, kind: input, shape index: {}]   ;;  %s1670_s8 = inlined_call_operand.vmem [shape: bf16[32,128], index: 8, kind: input, shape index: {}]   ;;  %s1671_s9 = inlined_call_operand.hbm [shape: f32[1,128], index: 9, kind: input, shape index: {}]   ;;  %s1672_s10 = inlined_call_operand.vmem [shape: bf16[128,128], index: 10, kind: input, shape index: {}]   ;;  %s1673_s11 = inlined_call_operand.vmem [shape: f32[1,128], index: 11, kind: input, shape index: {}]   ;;  %s1674_s12 = inlined_call_operand.vmem [shape: bf16[128,16], index: 12, kind: input, shape index: {}]   ;;  %s1675_s13 = inlined_call_operand.vmem [shape: f32[1,16], index: 13, kind: input, shape index: {}]   ;;  %s1676_s14 = inlined_call_operand.hbm [shape: f32[16,32], index: 14, kind: output, shape index: {0}]   ;;  %s1677_s15 = inlined_call_operand.hbm [shape: f32[1,1,1], index: 15, kind: output, shape index: {1}]   ;;  %s1678_s16 = inlined_call_operand.hbm [shape: f32[1,1,1], index: 16, kind: output, shape index: {2}]  }
   0x1   :  { %1680 = sst [smem:[#allocation20_spill]] %s1662_s0 }
   0x2   :  { %22 = vsyncpa [#allocation3], 0 }
   0x3   :  { %23 = vsyncpa [#allocation6], 0 }
   0x4   :  { %24 = vsyncpa [#allocation9], 0 }
   0x5   :  { %25 = vsyncpa [#allocation4], 0 }
   0x6   :  { %26 = vsyncpa [#allocation13], 0  ;;  %s1340_s21 = smov [#allocation5]   ;;  %s1341_s23 = smov [#allocation8]  }
   0x7   :  { %s65_s22 = sshll.u32 %s1340_s21, 4  ;;  %s89_s24 = sshll.u32 %s1341_s23, 4  ;;  %s66_s22 = int_to_ptr.vmem [resolvable:$true] %s65_s22  ;;  %s90_s24 = int_to_ptr.vmem [resolvable:$true] %s89_s24 }
   0x8   :  { %s1178_s25 = scalar_lea.vmem %s66_s22, 16  ;;  %s1182_s26 = scalar_lea.vmem %s66_s22, 32 }
   0x9   :  { %p1179_p0 = scmp.ne.s32.totalorder %s66_s22, %s1178_s25  ;;  %p1183_p1 = scmp.lt.s32.totalorder %s66_s22, %s66_s22 }
   0xa   :  { %p1184_p2 = scmp.lt.s32.totalorder %s1182_s26, %s1178_s25 }
   0xc   :  { %p1185_p3 = por %p1184_p2, %p1183_p1 }
   0xe   :  { %p1186_p4 = pnand %p1185_p3, %p1179_p0 }
  0x10   :  { %1189 = shalt.err (!%p1186_p4)
}
  0x11   :  { %68 = dma.hbm_to_vmem [thread:$0]  %s1665_s3, 16, %s66_s22, [#allocation6]  }
  0x12   :  { %s1198_s29 = scalar_lea.vmem %s90_s24, 16  ;;  %s1202_s30 = scalar_lea.vmem %s90_s24, 32 }
  0x13   :  { %p1199_p5 = scmp.ne.s32.totalorder %s90_s24, %s1198_s29  ;;  %p1203_p6 = scmp.lt.s32.totalorder %s90_s24, %s90_s24 }
  0x14   :  { %p1204_p7 = scmp.lt.s32.totalorder %s1202_s30, %s1198_s29 }
  0x16   :  { %p1205_p8 = por %p1204_p7, %p1203_p6 }
  0x18   :  { %p1206_p9 = pnand %p1205_p8, %p1199_p5 }
  0x1a   :  { %1209 = shalt.err (!%p1206_p9)
}
  0x1b   :  { %92 = dma.hbm_to_vmem [thread:$0]  %s1669_s7, 16, %s90_s24, [#allocation9]  }
  0x1c   :  { %s1342_s18 = smov [#allocation2]  }
  0x1d   :  { %s52_s19 = sshll.u32 %s1342_s18, 4  ;;  %s53_s19 = int_to_ptr.vmem [resolvable:$true] %s52_s19 }
  0x1e   :  { %s1218_s20 = scalar_lea.vmem %s53_s19, 128  ;;  %p1223_p11 = scmp.lt.s32.totalorder %s53_s19, %s53_s19 }
  0x1f   :  { %p1219_p10 = scmp.ne.s32.totalorder %s53_s19, %s1218_s20  ;;  %p1224_p12 = scmp.lt.s32.totalorder %s1218_s20, %s1218_s20 }
  0x21   :  { %p1225_p13 = por %p1224_p12, %p1223_p11 }
  0x23   :  { %p1226_p0 = pnand %p1225_p13, %p1219_p10 }
  0x25   :  { %1229 = shalt.err (!%p1226_p0)
}
  0x26   :  { %s1343_s3 = smov 64   ;;  %s1344_s21 = smov 4  }
  0x27   :  { %58 = dma.hbm_to_vmem [thread:$0]  %s1664_s2, 128, %s53_s19, [#allocation3], %s1343_s3, %s1343_s3, %s1344_s21  }
  0x28   :  { %s1345_s25 = smov [#allocation7]   ;;  %s1346_s7 = smov [#allocation10]  }
  0x29   :  { %s77_s26 = sshll.u32 %s1345_s25, 4  ;;  %s101_s24 = sshll.u32 %s1346_s7, 4  ;;  %s78_s26 = int_to_ptr.vmem [resolvable:$true] %s77_s26  ;;  %s102_s24 = int_to_ptr.vmem [resolvable:$true] %s101_s24 }
  0x2a   :  { %s1238_s27 = scalar_lea.vmem %s78_s26, 16  ;;  %s1242_s28 = scalar_lea.vmem %s78_s26, 32 }
  0x2b   :  { %p1239_p1 = scmp.ne.s32.totalorder %s78_s26, %s1238_s27  ;;  %p1243_p2 = scmp.lt.s32.totalorder %s78_s26, %s78_s26 }
  0x2c   :  { %p1244_p3 = scmp.lt.s32.totalorder %s1242_s28, %s1238_s27 }
  0x2e   :  { %p1245_p4 = por %p1244_p3, %p1243_p2 }
  0x30   :  { %p1246_p5 = pnand %p1245_p4, %p1239_p1 }
  0x32   :  { %1249 = shalt.err (!%p1246_p5)
}
  0x33   :  { %80 = dma.hbm_to_vmem [thread:$0]  %s1667_s5, 16, %s78_s26, [#allocation6]  }
  0x34   :  { %s1258_s0 = scalar_lea.vmem %s102_s24, 16  ;;  %s1262_s2 = scalar_lea.vmem %s102_s24, 32 }
  0x35   :  { %p1259_p6 = scmp.ne.s32.totalorder %s102_s24, %s1258_s0  ;;  %p1263_p7 = scmp.lt.s32.totalorder %s102_s24, %s102_s24 }
  0x36   :  { %p1264_p8 = scmp.lt.s32.totalorder %s1262_s2, %s1258_s0 }
  0x38   :  { %p1265_p9 = por %p1264_p8, %p1263_p7 }
  0x3a   :  { %p1266_p10 = pnand %p1265_p9, %p1259_p6 }
  0x3c   :  { %1269 = shalt.err (!%p1266_p10)
}
  0x3d   :  { %104 = dma.hbm_to_vmem [thread:$0]  %s1671_s9, 16, %s102_s24, [#allocation9]  }
  0x3e   :  { %1330 = dma.done.wait [#allocation3], 128  }
  0x3f   :  { %1331 = vsyncadd [#allocation3], 4294967168 }
  0x40   :  { %1332 = dma.done.wait [#allocation6], 32  }
  0x41   :  { %1333 = vsyncadd [#allocation6], 4294967264 }
  0x42   :  { %1334 = dma.done.wait [#allocation9], 32  }
  0x43   :  { %1335 = vsyncadd [#allocation9], 4294967264  ;;  %v1347_v0 = vmov 0.0   ;;  %vm1348_vm0 = vmmov 0   ;;  %v1119_v1 = vld [vmem:[#allocation2] sm:$0xff]   ;;  %s1681_s19 = sld [smem:[#allocation20_spill]] }
  0x44   :  { %1005 = vmatprep.subr.bf16.mxu0 %v1347_v0  ;;  %1007 = vmatprep.mubr.msk.bf16.mxu0 %vm1348_vm0, %v1347_v0  ;;  %vm177_vm1 = vcmask 130048   ;;  %v1120_v5 = vld [vmem:[%s1666_s4 + $0x38] sm:$0xff]   ;;  %v1121_v6 = vld [vmem:[%s1666_s4 + $0x30] sm:$0xff]   ;;  %v1122_v7 = vld [vmem:[%s1666_s4 + $0x28] sm:$0xff]   ;;  %s1350_s5 = smov 96   ;;  %vm472_vm2 = vcmask 261120  }
  0x45   :  { %1011 = vmatprep.subr.bf16.mxu1 %v1347_v0  ;;  %1027 = vmatprep.mubr.msk.bf16.mxu1 %vm1348_vm0, %v1347_v0  ;;  %v1123_v8 = vld [vmem:[%s1666_s4 + $0x20] sm:$0xff]   ;;  %v1124_v9 = vld [vmem:[%s1666_s4 + $0x18] sm:$0xff]   ;;  %v1125_v10 = vld [vmem:[%s1666_s4 + $0x10] sm:$0xff]   ;;  %vm813_vm3 = vcmask 0  }
  0x46   :  { %1006 = vmatpush3.bf16.msra.mxu0 %v1119_v1  ;;  %1012 = vmatpush3.bf16.msra.mxu1 %v1120_v5  ;;  %v1126_v11 = vld [vmem:[%s1666_s4 + $0x8] sm:$0xff]   ;;  %v1127_v12 = vld [vmem:[%s1666_s4] sm:$0xff]   ;;  %v1128_v13 = vld [vmem:[%s1668_s6 + $0x38] sm:$0xff]   ;;  %814 = vst.msk [vmem:[#allocation12] sm:$0x1] %vm813_vm3, %v1347_v0 }
  0x47   :  { %1031 = vmatprep.subr.bf16.mxu0 %v1347_v0  ;;  %1013 = vmatprep.subr.bf16.mxu1 %v1347_v0  ;;  %v1129_v14 = vld [vmem:[%s1668_s6 + $0x30] sm:$0xff]   ;;  %v1130_v15 = vld [vmem:[%s1668_s6 + $0x28] sm:$0xff]   ;;  %v1131_v16 = vld [vmem:[%s1668_s6 + $0x20] sm:$0xff]   ;;  %815 = vst.msk [vmem:[#allocation14] sm:$0x1] %vm813_vm3, %v1347_v0 }
  0x48   :  { %v1132_v17 = vld [vmem:[%s1668_s6 + $0x18] sm:$0xff]   ;;  %v919_v18 = vld [vmem:[#allocation5] ss:$0 sm:$0xff]  ;;  %v1133_v28 = vld [vmem:[%s1668_s6 + $0x10] sm:$0xff]  }
  0x49   :  { %v1465_v2 = vld [vmem:[%s1681_s19] sm:$0xff]  ;;  %v1470_v3 = vld [vmem:[%s1681_s19 + $0x8] sm:$0xff]  ;;  %v1138_v61 = vld [vmem:[%s1672_s10 + $0x38] sm:$0xff]  }
  0x4a   :  { %v161_v4 = vpack.c.bf16 %v1470_v3, %v1465_v2  ;;  %1014 = vmatpush3.bf16.msra.mxu1 %v1121_v6  ;;  %v1134_v29 = vld [vmem:[%s1668_s6 + $0x8] sm:$0xff]   ;;  %v1135_v30 = vld [vmem:[%s1668_s6] sm:$0xff]   ;;  %s1349_s6 = smov 32   ;;  %v1139_v1 = vld [vmem:[%s1672_s10 + $0x30] sm:$0xff]  }
  0x4b   :  { %1015 = vmatprep.subr.bf16.mxu1 %v1347_v0  ;;  %v922_v31 = vld [vmem:[#allocation7] ss:$0 sm:$0xff]  ;;  %v931_v41 = vld [vmem:[#allocation8] ss:$0 sm:$0xff]  ;;  %v1137_v55 = vld [vmem:[%s1670_s8] sm:$0xff]  }
  0x4c   :  { %1008 = vmatmul.mubr.msk.bf16.vlgmr.msra.gmra.mxu0 %vm177_vm1, %v161_v4  ;;  %v1136_v54 = vld [vmem:[%s1670_s8 + $0x8] sm:$0xff]  }
  0x4d   :  { %1047 = vmatprep.mubr.msk.bf16.mxu0 %vm1348_vm0, %v1347_v0  ;;  %1032 = vmatpush3.bf16.msra.mxu0 %v1128_v13  ;;  %v1142_v13 = vld [vmem:[%s1672_s10 + $0x18] sm:$0xff]  }
  0x4e   :  { %1016 = vmatpush3.bf16.msra.mxu1 %v1122_v7  ;;  %1033 = vmatprep.subr.bf16.mxu0 %v1347_v0 }
  0x4f   :  { %1017 = vmatprep.subr.bf16.mxu1 %v1347_v0 }
  0x51   :  { %1034 = vmatpush3.bf16.msra.mxu0 %v1129_v14  ;;  %v458_v14 = vld [vmem:[%s1663_s1] sm:$0xff] }
  0x52   :  { %1018 = vmatpush3.bf16.msra.mxu1 %v1123_v8  ;;  %1035 = vmatprep.subr.bf16.mxu0 %v1347_v0 }
  0x53   :  { %1019 = vmatprep.subr.bf16.mxu1 %v1347_v0 }
  0x55   :  { %1036 = vmatpush3.bf16.msra.mxu0 %v1130_v15 }
  0x56   :  { %1020 = vmatpush3.bf16.msra.mxu1 %v1124_v9  ;;  %1037 = vmatprep.subr.bf16.mxu0 %v1347_v0  ;;  %v1140_v9 = vld [vmem:[%s1672_s10 + $0x28] sm:$0xff]  }
  0x57   :  { %1021 = vmatprep.subr.bf16.mxu1 %v1347_v0 }
  0x59   :  { %1038 = vmatpush3.bf16.msra.mxu0 %v1131_v16 }
  0x5a   :  { %1022 = vmatpush3.bf16.msra.mxu1 %v1125_v10  ;;  %1039 = vmatprep.subr.bf16.mxu0 %v1347_v0 }
  0x5b   :  { %1023 = vmatprep.subr.bf16.mxu1 %v1347_v0 }
  0x5d   :  { %1040 = vmatpush3.bf16.msra.mxu0 %v1132_v17  ;;  %v459_v17 = vld [vmem:[%s1663_s1 + $0x8] sm:$0xff] }
  0x5e   :  { %1024 = vmatpush3.bf16.msra.mxu1 %v1126_v11  ;;  %1041 = vmatprep.subr.bf16.mxu0 %v1347_v0 }
  0x5f   :  { %1025 = vmatprep.subr.bf16.mxu1 %v1347_v0 }
  0x61   :  { %1042 = vmatpush3.bf16.msra.mxu0 %v1133_v28 }
  0x62   :  { %1026 = vmatpush3.bf16.msra.mxu1 %v1127_v12  ;;  %1043 = vmatprep.subr.bf16.mxu0 %v1347_v0  ;;  %v1141_v12 = vld [vmem:[%s1672_s10 + $0x20] sm:$0xff]  }
  0x63   :  { %1051 = vmatprep.subr.bf16.mxu1 %v1347_v0 }
  0x65   :  { %1044 = vmatpush3.bf16.msra.mxu0 %v1134_v29 }
  0x66   :  { %1045 = vmatprep.subr.bf16.mxu0 %v1347_v0 }
  0x69   :  { %1046 = vmatpush3.bf16.msra.mxu0 %v1135_v30 }
  0x6a   :  { %1059 = vmatprep.subr.bf16.mxu0 %v1347_v0 }
 0x10c   :  { %v215_v19 = vpop.f32.mrf.mxu0 }
 0x10d   :  { %v216_v21 = vadd.f32 %v919_v18, %v215_v19 }
 0x10e   :  { %v1009_v20 = vpop.f32.mrf.mxu0 }
 0x10f   :  { %v222_v25 = vmax.f32 %v216_v21, 0.0 }
 0x110   :  { %v218_v22 = vpop.f32.mrf.mxu0 }
 0x111   :  { %v219_v23 = vadd.f32 %v919_v18, %v218_v22 }
 0x112   :  { %v1010_v24 = vpop.f32.mrf.mxu0 }
 0x113   :  { %v223_v26 = vmax.f32 %v219_v23, 0.0  ;;  %v1143_v23 = vld [vmem:[%s1672_s10 + $0x10] sm:$0xff]   ;;  %v1144_v24 = vld [vmem:[%s1672_s10 + $0x8] sm:$0xff]  }
 0x115   :  { %v224_v27 = vpack.c.bf16 %v223_v26, %v222_v25  ;;  %v1145_v25 = vld [vmem:[%s1672_s10] sm:$0xff]  }
 0x117   :  { %1028 = vmatmul.mubr.bf16.vlgmr.msra.gmra.mxu1 %v224_v27 }
 0x118   :  { %1055 = vmatprep.mubr.msk.bf16.mxu1 %vm1348_vm0, %v1347_v0  ;;  %1052 = vmatpush3.bf16.msra.mxu1 %v1136_v54 }
 0x119   :  { %1053 = vmatprep.subr.bf16.mxu1 %v1347_v0 }
 0x11c   :  { %1054 = vmatpush3.bf16.msra.mxu1 %v1137_v55 }
 0x11d   :  { %1079 = vmatprep.subr.bf16.mxu1 %v1347_v0 }
 0x1d7   :  { %v330_v32 = vpop.f32.mrf.mxu1 }
 0x1d8   :  { %v331_v34 = vadd.f32 %v922_v31, %v330_v32  ;;  %v1147_v32 = vld [vmem:[%s1674_s12 + $0x30] sm:$0xff]  }
 0x1d9   :  { %v1029_v33 = vpop.f32.mrf.mxu1 }
 0x1da   :  { %v337_v38 = vmax.f32 %v331_v34, 0.0  ;;  %v1148_v33 = vld [vmem:[%s1674_s12 + $0x28] sm:$0xff]   ;;  %v1149_v34 = vld [vmem:[%s1674_s12 + $0x20] sm:$0xff]  }
 0x1db   :  { %v333_v35 = vpop.f32.mrf.mxu1 }
 0x1dc   :  { %v334_v36 = vadd.f32 %v922_v31, %v333_v35  ;;  %v1146_v31 = vld [vmem:[%s1674_s12 + $0x38] sm:$0xff]  }
 0x1dd   :  { %v1030_v37 = vpop.f32.mrf.mxu1  ;;  %v1150_v35 = vld [vmem:[%s1674_s12 + $0x18] sm:$0xff]  }
 0x1de   :  { %v338_v39 = vmax.f32 %v334_v36, 0.0  ;;  %v940_v36 = vld [vmem:[#allocation10] ss:$0 sm:$0xff] }
 0x1e0   :  { %v339_v40 = vpack.c.bf16 %v338_v39, %v337_v38 }
 0x1e2   :  { %1048 = vmatmul.mubr.bf16.vlgmr.msra.gmra.mxu0 %v339_v40 }
 0x1e3   :  { %1075 = vmatprep.mubr.msk.bf16.mxu0 %vm1348_vm0, %v1347_v0  ;;  %1060 = vmatpush3.bf16.msra.mxu0 %v1138_v61 }
 0x1e4   :  { %1061 = vmatprep.subr.bf16.mxu0 %v1347_v0 }
 0x1e7   :  { %1062 = vmatpush3.bf16.msra.mxu0 %v1139_v1 }
 0x1e8   :  { %1063 = vmatprep.subr.bf16.mxu0 %v1347_v0 }
 0x1eb   :  { %1064 = vmatpush3.bf16.msra.mxu0 %v1140_v9 }
 0x1ec   :  { %1065 = vmatprep.subr.bf16.mxu0 %v1347_v0 }
 0x1ef   :  { %1066 = vmatpush3.bf16.msra.mxu0 %v1141_v12 }
 0x1f0   :  { %1067 = vmatprep.subr.bf16.mxu0 %v1347_v0 }
 0x1f3   :  { %1068 = vmatpush3.bf16.msra.mxu0 %v1142_v13 }
 0x1f4   :  { %1069 = vmatprep.subr.bf16.mxu0 %v1347_v0 }
 0x1f7   :  { %1070 = vmatpush3.bf16.msra.mxu0 %v1143_v23 }
 0x1f8   :  { %1071 = vmatprep.subr.bf16.mxu0 %v1347_v0 }
 0x1fb   :  { %1072 = vmatpush3.bf16.msra.mxu0 %v1144_v24 }
 0x1fc   :  { %1073 = vmatprep.subr.bf16.mxu0 %v1347_v0 }
 0x1ff   :  { %1074 = vmatpush3.bf16.msra.mxu0 %v1145_v25 }
 0x2a2   :  { %v445_v42 = vpop.f32.mrf.mxu0 }
 0x2a3   :  { %v1546_v43 = vadd.f32 %v931_v41, %v445_v42 }
 0x2a4   :  { %v1049_v44 = vpop.f32.mrf.mxu0 }
 0x2a5   :  { %v452_v45 = vmul.f32 0.5, %v1546_v43  ;;  %v791_v46 = vmul.f32 %v1546_v43, %v1546_v43  ;;  %v803_v58 = vmul.f32 1.442695, %v1546_v43  ;;  %v789_v60 = vadd.f32 1.0, %v1546_v43 }
 0x2a6   :  { %v448_v47 = vpop.f32.mrf.mxu0 }
 0x2a7   :  { %v454_v48 = vmul.f32 1.442695, %v452_v45  ;;  %v449_v49 = vadd.f32 %v931_v41, %v448_v47  ;;  %795 = vrot.lane.b32.xlu1 %v791_v46, %s1349_s6  ;;  %v1151_v46 = vld [vmem:[%s1674_s12 + $0x10] sm:$0xff]   ;;  %v1152_v47 = vld [vmem:[%s1674_s12 + $0x8] sm:$0xff]  }
 0x2a8   :  { %v1050_v50 = vpop.f32.mrf.mxu0 }
 0x2a9   :  { %v453_v51 = vmul.f32 0.5, %v449_v49  ;;  %v792_v52 = vmul.f32 %v449_v49, %v449_v49  ;;  %1154 = vpow2.f32 %v454_v48  ;;  %v805_v59 = vmul.f32 1.442695, %v449_v49  ;;  %v1153_v48 = vld [vmem:[%s1674_s12] sm:$0xff]  }
 0x2aa   :  { %v790_v6 = vadd.f32 1.0, %v449_v49 }
 0x2ab   :  { %v456_v53 = vmul.f32 1.442695, %v453_v51  ;;  %797 = vrot.lane.b32.xlu1 %v792_v52, %s1349_s6 }
 0x2ad   :  { %1156 = vpow2.f32 %v456_v53 }
 0x2ae   :  { %1158 = vpow2.f32 %v803_v58 }
 0x2af   :  { %1160 = vpow2.f32 %v805_v59  ;;  %v953_v59 = vld [vmem:[%s1675_s13] ss:$0 sm:$0xff] }
 0x2b6   :  { %v1155_v56 = vpop.eup %1154 }
 0x2b7   :  { %462 = vrot.lane.b32.xlu0 %v1155_v56, %s1350_s5 }
 0x2ba   :  { %v1157_v57 = vpop.eup %1156 }
 0x2bb   :  { %464 = vrot.lane.b32.xlu0 %v1157_v57, %s1350_s5  ;;  %v1159_v4 = vpop.eup %1158 }
 0x2bc   :  { %v1161_v10 = vpop.eup %1160 }
 0x319   :  { %v796_v62 = vpop.permute.xlu1 %795 }
 0x31a   :  { %v801_v63 = vsub.f32 %v789_v60, %v796_v62 }
 0x31c   :  { %v807_v5 = vsub.f32 %v801_v63, %v1159_v4 }
 0x31d   :  { %v798_v7 = vpop.permute.xlu1 %797 }
 0x31e   :  { %v802_v8 = vsub.f32 %v790_v6, %v798_v7  ;;  %836 = vrot.lane.b32.xlu0 %v807_v5, %s1350_s5 }
 0x320   :  { %v808_v11 = vsub.f32 %v802_v8, %v1161_v10 }
 0x322   :  { %838 = vrot.lane.b32.xlu1 %v808_v11, %s1350_s5 }
 0x329   :  { %v463_v15 = vpop.permute.xlu0 %462 }
 0x32a   :  { %v468_v16 = vmul.f32 %v463_v15, %v458_v14 }
 0x32c   :  { %v470_v18 = vadd.f32 %v468_v16, %v1546_v43 }
 0x32d   :  { %v465_v19 = vpop.permute.xlu0 %464 }
 0x32e   :  { %v469_v20 = vmul.f32 %v465_v19, %v459_v17  ;;  %473 = vst.msk [vmem:[#allocation11] sm:$0xff] %vm472_vm2, %v470_v18 }
 0x330   :  { %v471_v21 = vadd.f32 %v469_v20, %v449_v49  ;;  %v944_v49 = vld [vmem:[%s1673_s11] ss:$0 sm:$0xff]  ;;  %s1351_s11 = smov [#allocation11]  }
 0x331   :  { %s866_s12 = sshll.u32 %s1351_s11, 4  ;;  %s867_s12 = int_to_ptr.vmem [resolvable:$true] %s866_s12 }
 0x332   :  { %v475_v22 = vpack.c.bf16 %v471_v21, %v470_v18  ;;  %474 = vst.msk [vmem:[#allocation11 + $0x8] sm:$0xff] %vm472_vm2, %v471_v21  ;;  %s1270_s13 = scalar_lea.vmem %s867_s12, 256  ;;  %p1275_p12 = scmp.lt.s32.totalorder %s867_s12, %s867_s12 }
 0x333   :  { %p1271_p11 = scmp.ne.s32.totalorder %s867_s12, %s1270_s13  ;;  %p1276_p13 = scmp.lt.s32.totalorder %s1270_s13, %s1270_s13 }
 0x334   :  { %1056 = vmatmul.mubr.msk.bf16.vlgmr.msra.gmra.mxu1 %vm472_vm2, %v475_v22 }
 0x335   :  { %1095 = vmatprep.mubr.msk.bf16.mxu1 %vm1348_vm0, %v1347_v0  ;;  %1080 = vmatpush3.bf16.msra.mxu1 %v1146_v31  ;;  %p1277_p0 = por %p1276_p13, %p1275_p12 }
 0x336   :  { %1081 = vmatprep.subr.bf16.mxu1 %v1347_v0 }
 0x337   :  { %p1278_p1 = pnand %p1277_p0, %p1271_p11 }
 0x339   :  { %1082 = vmatpush3.bf16.msra.mxu1 %v1147_v32 }
 0x33a   :  { %1083 = vmatprep.subr.bf16.mxu1 %v1347_v0 }
 0x33d   :  { %1084 = vmatpush3.bf16.msra.mxu1 %v1148_v33 }
 0x33e   :  { %1085 = vmatprep.subr.bf16.mxu1 %v1347_v0 }
 0x341   :  { %1086 = vmatpush3.bf16.msra.mxu1 %v1149_v34 }
 0x342   :  { %1087 = vmatprep.subr.bf16.mxu1 %v1347_v0 }
 0x345   :  { %1088 = vmatpush3.bf16.msra.mxu1 %v1150_v35 }
 0x346   :  { %1089 = vmatprep.subr.bf16.mxu1 %v1347_v0 }
 0x349   :  { %1090 = vmatpush3.bf16.msra.mxu1 %v1151_v46 }
 0x34a   :  { %1091 = vmatprep.subr.bf16.mxu1 %v1347_v0 }
 0x34d   :  { %1092 = vmatpush3.bf16.msra.mxu1 %v1152_v47 }
 0x34e   :  { %1093 = vmatprep.subr.bf16.mxu1 %v1347_v0 }
 0x351   :  { %1094 = vmatpush3.bf16.msra.mxu1 %v1153_v48 }
 0x390   :  { %v837_v26 = vpop.permute.xlu0 %836 }
 0x391   :  { %v842_v28 = vsel %vm472_vm2, %v837_v26, 0.0 }
 0x394   :  { %v839_v27 = vpop.permute.xlu1 %838 }
 0x395   :  { %v843_v29 = vsel %vm472_vm2, %v839_v27, 0.0 }
 0x396   :  { %v844_v30 = vadd.f32 %v843_v29, %v842_v28 }
 0x398   :  { %845 = vadd.xlane.f32.xlu1 %v844_v30 }
 0x3f4   :  { %v536_v37 = vpop.f32.mrf.mxu1 }
 0x3f5   :  { %v537_v39 = vadd.f32 %v940_v36, %v536_v37 }
 0x3f6   :  { %v1057_v38 = vpop.f32.mrf.mxu1 }
 0x3f7   :  { %v543_v43 = vmax.f32 %v537_v39, 0.0 }
 0x3f8   :  { %v539_v40 = vpop.f32.mrf.mxu1 }
 0x3f9   :  { %v540_v41 = vadd.f32 %v940_v36, %v539_v40 }
 0x3fa   :  { %v1058_v42 = vpop.f32.mrf.mxu1 }
 0x3fb   :  { %v544_v44 = vmax.f32 %v540_v41, 0.0 }
 0x3fd   :  { %v545_v45 = vpack.c.bf16 %v544_v44, %v543_v43 }
 0x3ff   :  { %1076 = vmatmul.mubr.bf16.vlgmr.msra.gmra.mxu0 %v545_v45 }
 0x4bf   :  { %v651_v50 = vpop.f32.mrf.mxu0 }
 0x4c0   :  { %v652_v52 = vadd.f32 %v944_v49, %v651_v50 }
 0x4c1   :  { %v1077_v51 = vpop.f32.mrf.mxu0 }
 0x4c2   :  { %v658_v56 = vmax.f32 %v652_v52, 0.0 }
 0x4c3   :  { %v654_v53 = vpop.f32.mrf.mxu0 }
 0x4c4   :  { %v655_v54 = vadd.f32 %v944_v49, %v654_v53 }
 0x4c5   :  { %v1078_v55 = vpop.f32.mrf.mxu0 }
 0x4c6   :  { %v659_v57 = vmax.f32 %v655_v54, 0.0 }
 0x4c8   :  { %v660_v58 = vpack.c.bf16 %v659_v57, %v658_v56 }
 0x4ca   :  { %1096 = vmatmul.mubr.bf16.vlgmr.msra.gmra.mxu1 %v660_v58 }
 0x58a   :  { %v766_v60 = vpop.f32.mrf.mxu1 }
 0x58b   :  { %v767_v61 = vadd.f32 %v953_v59, %v766_v60 }
 0x58c   :  { %v1097_v62 = vpop.f32.mrf.mxu1 }
 0x58d   :  { %v962_v63 = vmul.f32 -1.442695, %v767_v61 }
 0x58e   :  { %v769_v1 = vpop.f32.mrf.mxu1 }
 0x58f   :  { %1162 = vpow2.f32 %v962_v63  ;;  %v770_v4 = vadd.f32 %v953_v59, %v769_v1 }
 0x590   :  { %v1098_v5 = vpop.f32.mrf.mxu1 }
 0x591   :  { %v963_v6 = vmul.f32 -1.442695, %v770_v4 }
 0x593   :  { %1164 = vpow2.f32 %v963_v6 }
 0x59c   :  { %v1163_v7 = vpop.eup %1162 }
 0x59d   :  { %v779_v8 = vadd.f32 1.0, %v1163_v7 }
 0x59f   :  { %1166 = vrcp.f32 %v779_v8 }
 0x5a0   :  { %v1165_v9 = vpop.eup %1164 }
 0x5a1   :  { %v780_v10 = vadd.f32 1.0, %v1165_v9 }
 0x5a3   :  { %1168 = vrcp.f32 %v780_v10 }
 0x5ac   :  { %v1167_v11 = vpop.eup %1166 }
 0x5ad   :  { %v785_v12 = vsub.f32 %v1167_v11, %v1465_v2 }
 0x5af   :  { %v787_v15 = vmul.f32 %v785_v12, %v785_v12 }
 0x5b0   :  { %v1169_v13 = vpop.eup %1168 }
 0x5b1   :  { %v786_v14 = vsub.f32 %v1169_v13, %v1470_v3  ;;  %v817_v17 = vsel %vm177_vm1, %v787_v15, 0.0 }
 0x5b3   :  { %v788_v16 = vmul.f32 %v786_v14, %v786_v14 }
 0x5b5   :  { %v818_v18 = vsel %vm177_vm1, %v788_v16, 0.0 }
 0x5b6   :  { %v819_v19 = vadd.f32 %v818_v18, %v817_v17 }
 0x5b8   :  { %820 = vadd.xlane.f32.xlu0 %v819_v19 }
 0x5b9   :  { %1281 = shalt.err (!%p1278_p1)
}
 0x5ba   :  { %s1352_s1 = smov 128   ;;  %s1353_s29 = smov 8   ;;  %v846_v2 = vpop.xlane.xlu1 %845  ;;  %v816_v31 = vld [vmem:[#allocation12] sm:$0x1]  ;;  %v833_v32 = vld [vmem:[#allocation14] sm:$0x1] }
 0x5bb   :  { %872 = dma.vmem_to_hbm [thread:$0]  %s867_s12, 256, %s1676_s14, [#allocation4], %s1352_s1, %s1352_s1, %s1353_s29   ;;  %v847_v3 = vrot.slane %v846_v2, 4 }
 0x5bc   :  { %s1354_s0 = smov [#allocation12]   ;;  %s1355_s17 = smov [#allocation14]  }
 0x5bd   :  { %v848_v20 = vadd.f32 %v847_v3, %v846_v2  ;;  %s879_s2 = sshll.u32 %s1354_s0, 4  ;;  %s889_s18 = sshll.u32 %s1355_s17, 4  ;;  %s880_s2 = int_to_ptr.vmem [resolvable:$true] %s879_s2  ;;  %s890_s18 = int_to_ptr.vmem [resolvable:$true] %s889_s18 }
 0x5be   :  { %s1290_s10 = scalar_lea.vmem %s880_s2, 16  ;;  %s1294_s9 = scalar_lea.vmem %s880_s2, 32 }
 0x5bf   :  { %v849_v0 = vrot.slane %v848_v20, 2  ;;  %p1291_p2 = scmp.ne.s32.totalorder %s880_s2, %s1290_s10  ;;  %p1295_p3 = scmp.lt.s32.totalorder %s880_s2, %s880_s2 }
 0x5c0   :  { %p1296_p4 = scmp.lt.s32.totalorder %s1294_s9, %s1290_s10 }
 0x5c1   :  { %v850_v24 = vadd.f32 %v849_v0, %v848_v20 }
 0x5c2   :  { %p1297_p5 = por %p1296_p4, %p1295_p3 }
 0x5c3   :  { %v851_v27 = vrot.slane %v850_v24, 1 }
 0x5c4   :  { %p1298_p6 = pnand %p1297_p5, %p1291_p2 }
 0x5c5   :  { %v852_v30 = vadd.f32 %v851_v27, %v850_v24 }
 0x641   :  { %v821_v21 = vpop.xlane.xlu0 %820 }
 0x642   :  { %v822_v22 = vrot.slane %v821_v21, 4 }
 0x644   :  { %v823_v23 = vadd.f32 %v822_v22, %v821_v21 }
 0x646   :  { %v824_v25 = vrot.slane %v823_v23, 2 }
 0x648   :  { %v825_v26 = vadd.f32 %v824_v25, %v823_v23 }
 0x64a   :  { %v826_v28 = vrot.slane %v825_v26, 1 }
 0x64c   :  { %v827_v29 = vadd.f32 %v826_v28, %v825_v26 }
 0x64e   :  { %1099 = vpush %v827_v29 }
 0x64f   :  { %1101 = vpush %v852_v30 }
 0x67f   :  { %s1100_s14 = spop %1099 }
 0x680   :  { %v829_v33 = vstv %s1100_s14  ;;  %s1102_s5 = spop %1101 }
 0x681   :  { %v830_v34 = vadd.f32 %v829_v33, %v816_v31  ;;  %v854_v35 = vstv %s1102_s5 }
 0x682   :  { %v855_v36 = vadd.f32 %v854_v35, %v833_v32 }
 0x683   :  { %832 = vst.msk [vmem:[#allocation12] sm:$0x1] %vm813_vm3, %v830_v34 }
 0x684   :  { %856 = vst.msk [vmem:[#allocation14] sm:$0x1] %vm813_vm3, %v855_v36 }
 0x685   :  { %1301 = shalt.err (!%p1298_p6)
}
 0x686   :  { %882 = dma.vmem_to_hbm [thread:$0]  %s880_s2, 16, %s1677_s15, [#allocation13]  }
 0x687   :  { %s1310_s20 = scalar_lea.vmem %s890_s18, 16  ;;  %s1314_s3 = scalar_lea.vmem %s890_s18, 32 }
 0x688   :  { %p1311_p7 = scmp.ne.s32.totalorder %s890_s18, %s1310_s20  ;;  %p1315_p8 = scmp.lt.s32.totalorder %s890_s18, %s890_s18 }
 0x689   :  { %p1316_p9 = scmp.lt.s32.totalorder %s1314_s3, %s1310_s20 }
 0x68b   :  { %p1317_p10 = por %p1316_p9, %p1315_p8 }
 0x68d   :  { %p1318_p11 = pnand %p1317_p10, %p1311_p7 }
 0x68f   :  { %1321 = shalt.err (!%p1318_p11)
}
 0x690   :  { %892 = dma.vmem_to_hbm [thread:$0]  %s890_s18, 16, %s1678_s16, [#allocation13]  }
 0x691   :  { %1336 = dma.done.wait [#allocation4], 256  }
 0x692   :  { %1337 = vsyncadd [#allocation4], 4294967040 }
 0x693   :  { %1338 = dma.done.wait [#allocation13], 32  }
 0x694   :  { %1339 = vsyncadd [#allocation13], 4294967264 }
 0x695   :  { %902 = vsyncpa [#allocation3], 1 }
 0x696   :  { %903 = vsyncpa [#allocation6], 1 }
 0x697   :  { %904 = vsyncpa [#allocation9], 1 }
 0x698   :  { %905 = vsyncpa [#allocation4], 1 }
 0x699   :  { %906 = vsyncpa [#allocation13], 1 }

</bundles_post_ra>
